<compile_context>
chip_gen: v7x
topology: tpu7x:2x2x1
jax: 0.10.0
libtpu: 0.0.40
codegen_flags: <defaults>
</compile_context>

<pallas_src>
import jax
import jax.numpy as jnp
from jax import lax
from jax.experimental import pallas as pl
from jax.experimental.pallas import tpu as pltpu


def mf_dot_kernel(u_idx_ref, i_idx_ref,        # scalar prefetch (SMEM): (Bp,) int32
                  user_tbl_ref, item_tbl_ref,  # VMEM-resident embedding tables
                  o_ref,                       # (1, tb) f32 output tile (lane-dense)
                  u_buf, i_buf):               # (tb, D) f32 VMEM scratch tiles
    tb = u_buf.shape[0]
    base = pl.program_id(0) * tb

    # Fused embedding gather: copy the rows selected by this batch tile from
    # the VMEM-resident tables into contiguous scratch tiles.
    def gather_row(r, carry):
        u_row = u_idx_ref[base + r]
        i_row = i_idx_ref[base + r]
        u_buf[pl.ds(r, 1), :] = user_tbl_ref[pl.ds(u_row, 1), :]
        i_buf[pl.ds(r, 1), :] = item_tbl_ref[pl.ds(i_row, 1), :]
        return carry

    lax.fori_loop(0, tb, gather_row, 0)

    # VPU elementwise multiply + cross-lane reduce over the embedding dim.
    prod = u_buf[...] * i_buf[...]                     # (tb, D)
    dots = jnp.sum(prod, axis=1)                       # (tb,)
    # Lane-dense store: batch maps to the lanes of the (1, tb) output row.
    o_ref[...] = dots[None, :].astype(o_ref.dtype)


def matrix_factorization_forward(user_table, item_table, u, i, *, tb=1024,
                                 vmem_limit_bytes=32 * 1024 * 1024):
    """Computes (user_table[u] * item_table[i]).sum(-1) -> (B,) float32."""
    n_users, D = user_table.shape
    n_items, D_i = item_table.shape
    assert D == D_i, "user/item embedding sizes must match"

    u = u.astype(jnp.int32)
    i = i.astype(jnp.int32)
    B = u.shape[0]

    # Batch tile: as large as possible (amortizes per-grid-step overhead),
    # multiple of 128 when tiling so output stores are full lane width.
    # Ragged batches are padded with index 0 and sliced off afterwards.
    if B <= tb:
        tb_eff = B
    else:
        tb_eff = max(128, (tb // 128) * 128)
    Bp = pl.cdiv(B, tb_eff) * tb_eff
    if Bp != B:
        u = jnp.pad(u, (0, Bp - B))
        i = jnp.pad(i, (0, Bp - B))

    grid = (Bp // tb_eff,)

    out = pl.pallas_call(
        mf_dot_kernel,
        out_shape=jax.ShapeDtypeStruct((1, Bp), jnp.float32),
        grid_spec=pltpu.PrefetchScalarGridSpec(
            num_scalar_prefetch=2,            # u and i index vectors -> SMEM
            grid=grid,
            in_specs=[
                # Full tables with a constant block index: loaded once and
                # kept resident in VMEM across all batch tiles.
                pl.BlockSpec((n_users, D), lambda b, u_idx, i_idx: (0, 0)),
                pl.BlockSpec((n_items, D), lambda b, u_idx, i_idx: (0, 0)),
            ],
            # Lane-dense (1, tb) output row per grid step.
            out_specs=pl.BlockSpec((1, tb_eff), lambda b, u_idx, i_idx: (0, b)),
            scratch_shapes=[
                pltpu.VMEM((tb_eff, D), jnp.float32),
                pltpu.VMEM((tb_eff, D), jnp.float32),
            ],
        ),
        compiler_params=pltpu.CompilerParams(
            dimension_semantics=("parallel",),   # independent batch tiles
            vmem_limit_bytes=vmem_limit_bytes,   # headroom for large tiles,
                                                 # still under v7x scoped VMEM
        ),
    )(u, i, user_table, item_table)

    return out[0, :B]  # (B,) float32


if __name__ == "__main__":
    # Deterministic synthetic parameters / inputs (no checkpoint loading).
    n_users, n_items, embedding_size = 64, 96, 128
    batch = 8

    key = jax.random.PRNGKey(0)
    k_user, k_item, k_u, k_i = jax.random.split(key, 4)

    # nn.Embedding default init ~ N(0, 1), float32.
    user_table = jax.random.normal(k_user, (n_users, embedding_size), jnp.float32)
    item_table = jax.random.normal(k_item, (n_items, embedding_size), jnp.float32)

    u = jax.random.randint(k_u, (batch,), 0, n_users, dtype=jnp.int32)
    i = jax.random.randint(k_i, (batch,), 0, n_items, dtype=jnp.int32)

    out = matrix_factorization_forward(user_table, item_table, u, i)
    out = jax.block_until_ready(out)

    # Pure-JAX reference for correctness.
    ref = jnp.sum(user_table[u] * item_table[i], axis=1)
    assert out.shape == (batch,)
    assert out.dtype == jnp.float32
    assert jnp.allclose(out, ref, rtol=1e-5, atol=1e-5)

    # Also exercise the multi-tile / ragged-batch path (grid > 1, padding,
    # 128-lane-aligned tiles) to cover the performance configuration.
    batch2 = 1000
    k_u2, k_i2 = jax.random.split(jax.random.PRNGKey(1), 2)
    u2 = jax.random.randint(k_u2, (batch2,), 0, n_users, dtype=jnp.int32)
    i2 = jax.random.randint(k_i2, (batch2,), 0, n_items, dtype=jnp.int32)
    out2 = jax.block_until_ready(
        matrix_factorization_forward(user_table, item_table, u2, i2, tb=256))
    ref2 = jnp.sum(user_table[u2] * item_table[i2], axis=1)
    assert out2.shape == (batch2,)
    assert jnp.allclose(out2, ref2, rtol=1e-5, atol=1e-5)

    print("KERNEL_OK")
</pallas_src>

<mosaic_0001>
module attributes {stable_mosaic.version = 11 : i64} {
  func.func @mf_dot_kernel(%arg0: i32, %arg1: memref<8xi32, #tpu.memory_space<smem>>, %arg2: memref<8xi32, #tpu.memory_space<smem>>, %arg3: memref<64x128xf32, #tpu.memory_space<vmem>>, %arg4: memref<96x128xf32, #tpu.memory_space<vmem>>, %arg5: memref<1x8xf32, #tpu.memory_space<vmem>>, %arg6: memref<8x128xf32, #tpu.memory_space<vmem>>, %arg7: memref<8x128xf32, #tpu.memory_space<vmem>>) attributes {dimension_semantics = [#tpu.dimension_semantics<parallel>], iteration_bounds = array<i64: 1>, scalar_prefetch = 2 : i64, scratch_operands = 2 : i64, tpu.core_type = #tpu.core_type<tc>, window_params = [{pipeline_mode = #tpu.pipeline_mode<synchronous>, transform_indices = @transform_0, window_bounds = array<i64: 64, 128>}, {pipeline_mode = #tpu.pipeline_mode<synchronous>, transform_indices = @transform_1, window_bounds = array<i64: 96, 128>}, {transform_indices = @transform_2, window_bounds = array<i64: 1, 8>}]} {
    %c8_i32 = arith.constant 8 : i32
    %0 = arith.muli %arg0, %c8_i32 : i32
    %c0_i32 = arith.constant 0 : i32
    %c8_i32_0 = arith.constant 8 : i32
    %1 = arith.addi %c0_i32, %c8_i32_0 : i32
    %c1_i32 = arith.constant 1 : i32
    scf.for %arg8 = %c0_i32 to %1 step %c1_i32  : i32 {
      %8 = arith.addi %0, %arg8 : i32
      %9 = arith.index_cast %8 : i32 to index
      %10 = memref.load %arg1[%9] : memref<8xi32, #tpu.memory_space<smem>>
      %11 = arith.addi %0, %arg8 : i32
      %12 = arith.index_cast %11 : i32 to index
      %13 = memref.load %arg2[%12] : memref<8xi32, #tpu.memory_space<smem>>
      %14 = arith.index_cast %10 : i32 to index
      %c0_7 = arith.constant 0 : index
      %15 = vector.load %arg3[%14, %c0_7] : memref<64x128xf32, #tpu.memory_space<vmem>>, vector<1x128xf32>
      %16 = arith.index_cast %arg8 : i32 to index
      %c0_8 = arith.constant 0 : index
      %17 = vector.load %arg6[%16, %c0_8] : memref<8x128xf32, #tpu.memory_space<vmem>>, vector<1x128xf32>
      tpu.vector_store %arg6[%16, %c0_8], %15 {strides = array<i32>} : memref<8x128xf32, #tpu.memory_space<vmem>>, vector<1x128xf32>,
      %18 = arith.index_cast %13 : i32 to index
      %c0_9 = arith.constant 0 : index
      %19 = vector.load %arg4[%18, %c0_9] : memref<96x128xf32, #tpu.memory_space<vmem>>, vector<1x128xf32>
      %20 = arith.index_cast %arg8 : i32 to index
      %c0_10 = arith.constant 0 : index
      %21 = vector.load %arg7[%20, %c0_10] : memref<8x128xf32, #tpu.memory_space<vmem>>, vector<1x128xf32>
      tpu.vector_store %arg7[%20, %c0_10], %19 {strides = array<i32>} : memref<8x128xf32, #tpu.memory_space<vmem>>, vector<1x128xf32>,
    }
    %c8_i32_1 = arith.constant 8 : i32
    %c0 = arith.constant 0 : index
    %c0_2 = arith.constant 0 : index
    %2 = vector.load %arg6[%c0, %c0_2] : memref<8x128xf32, #tpu.memory_space<vmem>>, vector<8x128xf32>
    %c0_3 = arith.constant 0 : index
    %c0_4 = arith.constant 0 : index
    %3 = vector.load %arg7[%c0_3, %c0_4] : memref<8x128xf32, #tpu.memory_space<vmem>>, vector<8x128xf32>
    %4 = arith.mulf %2, %3 : vector<8x128xf32>
    %cst = arith.constant dense<0.000000e+00> : vector<8xf32>
    %5 = vector.multi_reduction <add>, %4, %cst [1] : vector<8x128xf32> to vector<8xf32>
    %6 = vector.shape_cast %5 : vector<8xf32> to vector<1x8xf32>
    %c0_5 = arith.constant 0 : index
    %c0_6 = arith.constant 0 : index
    %7 = vector.load %arg5[%c0_5, %c0_6] : memref<1x8xf32, #tpu.memory_space<vmem>>, vector<1x8xf32>
    tpu.vector_store %arg5[%c0_5, %c0_6], %6 {strides = array<i32>} : memref<1x8xf32, #tpu.memory_space<vmem>>, vector<1x8xf32>,
    return
  }
  func.func @transform_0(%arg0: i32, %arg1: memref<8xi32, #tpu.memory_space<smem>>, %arg2: memref<8xi32, #tpu.memory_space<smem>>) -> (i32, i32) {
    %c0_i32 = arith.constant 0 : i32
    %c0_i32_0 = arith.constant 0 : i32
    %c0_i32_1 = arith.constant 0 : i32
    return %c0_i32, %c0_i32_0 : i32, i32
  }
  func.func @transform_1(%arg0: i32, %arg1: memref<8xi32, #tpu.memory_space<smem>>, %arg2: memref<8xi32, #tpu.memory_space<smem>>) -> (i32, i32) {
    %c0_i32 = arith.constant 0 : i32
    %c0_i32_0 = arith.constant 0 : i32
    %c0_i32_1 = arith.constant 0 : i32
    return %c0_i32, %c0_i32_0 : i32, i32
  }
  func.func @transform_2(%arg0: i32, %arg1: memref<8xi32, #tpu.memory_space<smem>>, %arg2: memref<8xi32, #tpu.memory_space<smem>>) -> (i32, i32) {
    %c0_i32 = arith.constant 0 : i32
    %c0_i32_0 = arith.constant 0 : i32
    return %c0_i32, %arg0 : i32, i32
  }
}

</mosaic_0001>

<bundles_post_ra>
// kernel: tpu_custom_call.1
= control target key start
LH: loop header
LB: loop body
LE: loop exit
PB: predicated region body
PF: predicated region fallthrough
CT: control target
= control target key end

     0   :  { %s310_s0 = inlined_call_operand.hbm [shape: s32[8], index: 0, kind: input, shape index: {}]   ;;  %s311_s2 = inlined_call_operand.hbm [shape: f32[64,128], index: 2, kind: input, shape index: {}]   ;;  %s312_s3 = inlined_call_operand.hbm [shape: f32[96,128], index: 3, kind: input, shape index: {}]   ;;  %s313_s4 = inlined_call_operand.hbm [shape: f32[1,8], index: 4, kind: output, shape index: {}]   ;;  %s314_s1 = inlined_call_operand.vmem [shape: s32[8], index: 1, kind: input, shape index: {}]  }
   0x1   :  { %s123_s17 = scalar_lea.hbm %s310_s0, 16 }
   0x2   :  { %p124_p0 = scmp.ne.s32.totalorder %s310_s0, %s123_s17  ;;  %p127_p1 = scmp.lt.u32.totalorder %s123_s17, %s310_s0 }
   0x4   :  { %p129_p2 = pnand %p127_p1, %p124_p0 }
   0x6   :  { %132 = shalt.err (!%p129_p2)  }
   0x7   :  { %s227_s22 = smov [#allocation5]   ;;  %s11_s27 = sshll.u32 %s314_s1, 4  ;;  %s12_s27 = int_to_ptr.vmem [resolvable:$true] %s11_s27 }
   0x8   :  { %10 = dma.hbm_to_smem %s310_s0, 16, %s227_s22, [#allocation4] }
   0x9   :  { %s133_s28 = scalar_lea.vmem %s12_s27, 16  ;;  %p138_p4 = scmp.lt.s32.totalorder %s12_s27, %s12_s27 }
   0xa   :  { %p134_p3 = scmp.ne.s32.totalorder %s12_s27, %s133_s28  ;;  %p139_p5 = scmp.lt.s32.totalorder %s133_s28, %s133_s28 }
   0xc   :  { %p140_p6 = por %p139_p5, %p138_p4 }
   0xe   :  { %p141_p7 = pnand %p140_p6, %p134_p3 }
  0x10   :  { %144 = shalt.err (!%p141_p7)  }
  0x11   :  { %s228_s29 = smov [#allocation6]  }
  0x12   :  { %14 = dma.vmem_to_smem %s12_s27, 16, %s228_s29, [#allocation4] }
  0x13   :  { %215 = dma.done.wait [#allocation4], 32 }
  0x14   :  { %216 = vsyncadd [#allocation4], 4294967264 }
  0x15   :  { %16 = sfence }
  0x16   :  { %17 = vsyncpa [#allocation8], 0 }
  0x17   :  { %18 = vsyncpa [#allocation11], 0 }
  0x18   :  { %19 = vsyncpa [#allocation9], 0  ;;  %s229_s0 = smov [#allocation7]   ;;  %s145_s6 = scalar_lea.hbm %s311_s2, 1024 }
  0x19   :  { %s25_s30 = sshll.u32 %s229_s0, 4  ;;  %p146_p8 = scmp.ne.s32.totalorder %s311_s2, %s145_s6  ;;  %s26_s30 = int_to_ptr.vmem [resolvable:$true] %s25_s30 }
  0x1a   :  { %p149_p9 = scmp.lt.u32.totalorder %s145_s6, %s311_s2 }
  0x1c   :  { %p151_p10 = pnand %p149_p9, %p146_p8 }
  0x1e   :  { %154 = shalt.err (!%p151_p10)
}
  0x1f   :  { %s155_s11 = scalar_lea.vmem %s26_s30, 1024  ;;  %p160_p12 = scmp.lt.s32.totalorder %s26_s30, %s26_s30 }
  0x20   :  { %p156_p11 = scmp.ne.s32.totalorder %s26_s30, %s155_s11  ;;  %p161_p13 = scmp.lt.s32.totalorder %s155_s11, %s155_s11 }
  0x22   :  { %p162_p0 = por %p161_p13, %p160_p12 }
  0x24   :  { %p163_p1 = pnand %p162_p0, %p156_p11 }
  0x26   :  { %166 = shalt.err (!%p163_p1)
}
  0x27   :  { %s230_s12 = smov 128   ;;  %s231_s13 = smov 8  }
  0x28   :  { %31 = dma.hbm_to_vmem [thread:$0]  %s311_s2, 1024, %s26_s30, [#allocation8], %s230_s12, %s230_s12, %s231_s13  }
  0x29   :  { %s232_s16 = smov [#allocation10]   ;;  %s167_s20 = scalar_lea.hbm %s312_s3, 1536 }
  0x2a   :  { %s37_s17 = sshll.u32 %s232_s16, 4  ;;  %p168_p2 = scmp.ne.s32.totalorder %s312_s3, %s167_s20  ;;  %s38_s17 = int_to_ptr.vmem [resolvable:$true] %s37_s17 }
  0x2b   :  { %p171_p3 = scmp.lt.u32.totalorder %s167_s20, %s312_s3 }
  0x2d   :  { %p173_p4 = pnand %p171_p3, %p168_p2 }
  0x2f   :  { %176 = shalt.err (!%p173_p4)
}
  0x30   :  { %s177_s25 = scalar_lea.vmem %s38_s17, 1536  ;;  %p182_p6 = scmp.lt.s32.totalorder %s38_s17, %s38_s17 }
  0x31   :  { %p178_p5 = scmp.ne.s32.totalorder %s38_s17, %s177_s25  ;;  %p183_p7 = scmp.lt.s32.totalorder %s177_s25, %s177_s25 }
  0x33   :  { %p184_p8 = por %p183_p7, %p182_p6 }
  0x35   :  { %p185_p9 = pnand %p184_p8, %p178_p5 }
  0x37   :  { %188 = shalt.err (!%p185_p9)
}
  0x38   :  { %43 = dma.hbm_to_vmem [thread:$0]  %s312_s3, 1536, %s38_s17, [#allocation11], %s230_s12, %s230_s12, %s231_s13  }
  0x39   :  { %217 = dma.done.wait [#allocation8], 1024  }
  0x3a   :  { %218 = vsyncadd [#allocation8], 4294966272 }
  0x3b   :  { %219 = dma.done.wait [#allocation11], 1536  }
  0x3c   :  { %220 = vsyncadd [#allocation11], 4294965760  ;;  %s223_s27 = smov 0  }
  0x3d LB: > { %s58_s28 = sld [smem:[#allocation5 + %s225_s27]]  ;;  %s62_s30 = scalar_lea.vmem [#allocation2], %s225_s27  ;;  %s225_s27 = sphi %s223_s27, %s56_s27  }
  0x3e   : > { %s59_s29 = sld [smem:[#allocation6 + %s225_s27]]  ;;  %s66_s5 = scalar_lea.vmem [#allocation3], %s225_s27 }
  0x3f   : > { %s56_s27 = sadd.s32 1, %s225_s27  }
  0x40   : > { %p53_p10 = scmp.ge.s32.totalorder %s56_s27, 8  }
  0x41   :  { %v74_v5 = vlaneseq (%p53_p10)  ;;  %s233_s3 = smov (%p53_p10), [#allocation12]   ;;  %vm81_vm0 = vcmask (%p53_p10), 57344  }
  0x42   :  { %55 = sbr.rel (!%p53_p10) target bundleno = 61 (0x3d), region = 47  ;;  %s89_s6 = sshll.u32 (%p53_p10), %s233_s3, 4  ;;  %s90_s6 = int_to_ptr.vmem [resolvable:$true] %s89_s6 }
  0x43   : > { %s60_s0 = scalar_lea.vmem [#allocation7], %s58_s28  ;;  %v75_v6 = vand.u32 (%p53_p10), 127, %v74_v5  ;;  %v77_v7 = vshrl.u32 (%p53_p10), %v74_v5, 7  ;;  %s189_s7 = scalar_lea.vmem (%p53_p10), %s90_s6, 16 }
  0x44   : > { %v61_v0 = vld [vmem:[%s60_s0] sm:$0x1]  ;;  %s64_s1 = scalar_lea.vmem [#allocation10], %s59_s29  ;;  %p190_p11 = scmp.ne.s32.totalorder (%p53_p10), %s90_s6, %s189_s7 }
  0x45   : > { %63 = vst [vmem:[%s62_s30] sm:$0x1] %v61_v0  ;;  %v65_v1 = vld [vmem:[%s64_s1] sm:$0x1]  ;;  %v78_v8 = vsub.s32 (%p53_p10), %v75_v6, %v77_v7  ;;  %s193_s8 = scalar_lea.vmem (%p53_p10), %s90_s6, 32  ;;  %p194_p12 = scmp.lt.s32.totalorder (%p53_p10), %s90_s6, %s90_s6 }
  0x46   : > { %67 = vst [vmem:[%s66_s5] sm:$0x1] %v65_v1  ;;  %p195_p13 = scmp.lt.s32.totalorder (%p53_p10), %s193_s8, %s189_s7 }
  0x48   :  { %p196_p0 = por (%p53_p10), %p195_p13, %p194_p12 }
  0x4a   :  { %p197_p1 = pnand %p196_p0, %p190_p11 }
  0x4c   :  { %v68_v2 = vld [vmem:[#allocation2] sm:$0xff] }
  0x4d   :  { %v69_v3 = vld [vmem:[#allocation3] sm:$0xff] }
  0x4e   :  { %v70_v4 = vmul.f32 %v69_v3, %v68_v2 }
  0x50   :  { %71 = vadd.xlane.f32.xlu0 %v70_v4 }
  0xdd   :  { %v72_v9 = vpop.xlane.xlu0 %71 }
  0xde   :  { %v79_v10 = vrot.slane %v72_v9, %v78_v8 }
  0xe0   :  { %82 = vst.msk [vmem:[#allocation12] sm:$0x1] %vm81_vm0, %v79_v10 }
  0xe1   :  { %200 = shalt.err (!%p197_p1)
}
  0xe2   :  { %s201_s11 = scalar_lea.hbm %s313_s4, 16 }
  0xe3   :  { %p202_p2 = scmp.ne.s32.totalorder %s313_s4, %s201_s11  ;;  %p205_p3 = scmp.lt.u32.totalorder %s201_s11, %s313_s4 }
  0xe5   :  { %p207_p4 = pnand %p205_p3, %p202_p2 }
  0xe7   :  { %210 = shalt.err (!%p207_p4)
}
  0xe8   :  { %92 = dma.vmem_to_hbm [thread:$0]  %s90_s6, 16, %s313_s4, [#allocation9]  }
  0xe9   :  { %221 = dma.done.wait [#allocation9], 16  }
  0xea   :  { %222 = vsyncadd [#allocation9], 4294967280 }
  0xeb   :  { %96 = vsyncpa [#allocation8], 1 }
  0xec   :  { %97 = vsyncpa [#allocation11], 1 }
  0xed   :  { %98 = vsyncpa [#allocation9], 1 }

</bundles_post_ra>
